<compile_context>
chip_gen: v7x
topology: tpu7x:2x2x1
jax: 0.10.0
libtpu: 0.0.40
codegen_flags: <defaults>
</compile_context>

<pallas_src>
import numpy as np
import jax
import jax.numpy as jnp
from jax import lax
from jax.experimental import pallas as pl
from jax.experimental.pallas import tpu as pltpu

POOL = 4                    # F.avg_pool2d(x, 4): kernel_size=4, stride=4, no padding
_SMALL_PLANE_ELEMS = 2048   # planes up to this many elements use the flat-matmul path


def _round_up(x, m):
    return (x + m - 1) // m * m


def _pick_vmem_limit_bytes():
    """Per-generation scoped-VMEM limit: ~half the physical VMEM, clamped."""
    try:
        cap = pltpu.get_tpu_info().vmem_capacity_bytes
    except Exception:
        cap = 64 * 1024 * 1024
    return int(max(32 * 1024 * 1024, min(96 * 1024 * 1024, cap // 2)))


def _choose_block_planes(nc, per_plane_bytes, budget_bytes, min_steps=8):
    """Planes per grid step.  B must be a multiple of 8 (output-block sublane dim)
    unless it equals NC; prefer >= min_steps grid steps (>= 4 per v7x TensorCore)
    before maximizing the block, then cap by the padded VMEM budget."""
    if nc <= 8:
        return nc
    by_vmem = max(8, int(budget_bytes // max(per_plane_bytes, 1)) // 8 * 8)
    by_steps = max(8, (nc // min_steps) // 8 * 8)
    return min(by_vmem, by_steps, nc)


# ----------------------------------------------------------------------------
# Path A: small planes — one lane-dense row per plane, pooling = single matmul.
# ----------------------------------------------------------------------------
def _flat_pool_kernel(x_ref, m_ref, o_ref):
    # x_ref: (B, H*W) contiguous plane rows; m_ref: (H*W, Ho*Wo) averaging matrix
    # (carries the 1/16 scale and zero rows for any floor-mode H/W tail).
    out = jnp.dot(x_ref[...], m_ref[...], preferred_element_type=jnp.float32)
    o_ref[...] = out.astype(o_ref.dtype)


def _flat_pooling_matrix(H, W, Ho, Wo, dtype):
    hw = np.arange(H * W)
    h, w = hw // W, hw % W
    ho, wo = h // POOL, w // POOL
    valid = (ho < Ho) & (wo < Wo)             # floor-mode crop of H/W tails
    m = np.zeros((H * W, Ho * Wo), dtype=np.float32)
    m[hw[valid], (ho * Wo + wo)[valid]] = 1.0 / (POOL * POOL)
    return jnp.asarray(m, dtype=dtype)        # 1/16 exact in f32/bf16/f16


# ----------------------------------------------------------------------------
# Path B: larger planes — strided-sublane H reduction (VPU) + lane matmul (MXU).
# ----------------------------------------------------------------------------
def _make_tiled_pool_kernel(bp, H, W, Ho, Wo):
    def kernel(x_ref, o_ref):
        x = x_ref[...]                                        # (bp, H, W)
        # H (sublane) pooling: 4 strided slices + pairwise tree add; per-slice cast
        # avoids materializing a whole-block f32 copy for sub-f32 inputs.
        r0 = x[:, 0:POOL * Ho:POOL, :].astype(jnp.float32)
        r1 = x[:, 1:POOL * Ho:POOL, :].astype(jnp.float32)
        r2 = x[:, 2:POOL * Ho:POOL, :].astype(jnp.float32)
        r3 = x[:, 3:POOL * Ho:POOL, :].astype(jnp.float32)
        y = (r0 + r1) + (r2 + r3)                             # (bp, Ho, W) f32
        # W (lane) pooling on the MXU; averaging matrix built in-kernel (trivial VPU
        # work, power-of-2 divide), zero rows crop a non-multiple-of-4 W tail.
        w_i = lax.broadcasted_iota(jnp.int32, (W, Wo), 0)
        wo_i = lax.broadcasted_iota(jnp.int32, (W, Wo), 1)
        pw = jnp.where(w_i // POOL == wo_i, 1.0 / (POOL * POOL), 0.0)
        out = jnp.dot(y.reshape(bp * Ho, W), pw,
                      preferred_element_type=jnp.float32)     # (bp*Ho, Wo)
        o_ref[...] = out.reshape(bp, Ho * Wo).astype(o_ref.dtype)  # lane-dense store
    return kernel


# ----------------------------------------------------------------------------
# Wrapper
# ----------------------------------------------------------------------------
def avg_pool2d_pallas(x):
    """Equivalent of torch.nn.functional.avg_pool2d(x, 4) for NCHW input."""
    N, C, H, W = x.shape
    Ho, Wo = H // POOL, W // POOL
    if Ho == 0 or Wo == 0:
        raise ValueError("spatial dims must be >= 4 for 4x4 average pooling")
    if not jnp.issubdtype(x.dtype, jnp.floating):
        x = x.astype(jnp.float32)

    NC = N * C
    isz = jnp.dtype(x.dtype).itemsize
    vmem_limit = _pick_vmem_limit_bytes()
    budget = (vmem_limit * 7) // 10           # headroom for compiler scratch

    if H * W <= _SMALL_PLANE_ELEMS:
        # ---- Path A: flat lane-dense planes, pooling as one small matmul ----
        hw_pad = _round_up(H * W, 128)
        out_pad = _round_up(Ho * Wo, 128)
        m_bytes = 2 * _round_up(H * W, 8) * out_pad * isz        # resident matrix
        per_plane = (2 * hw_pad * isz          # double-buffered input row
                     + 2 * out_pad * isz       # double-buffered output row
                     + out_pad * 4)            # f32 matmul result
        B = _choose_block_planes(NC, per_plane, max(budget - m_bytes, per_plane))
        grid = (pl.cdiv(NC, B),)               # ragged tail handled by Pallas masking

        x_flat = x.reshape(NC, H * W)          # contiguous -> free reshape
        m = _flat_pooling_matrix(H, W, Ho, Wo, x.dtype)

        out_flat = pl.pallas_call(
            _flat_pool_kernel,
            out_shape=jax.ShapeDtypeStruct((NC, Ho * Wo), x.dtype),
            grid=grid,
            in_specs=[
                pl.BlockSpec((B, H * W), lambda i: (i, 0)),
                pl.BlockSpec((H * W, Ho * Wo), lambda i: (0, 0)),  # resident constant
            ],
            out_specs=pl.BlockSpec((B, Ho * Wo), lambda i: (i, 0)),
            compiler_params=pltpu.CompilerParams(
                dimension_semantics=("parallel",),
                vmem_limit_bytes=vmem_limit,
            ),
        )(x_flat, m)
    else:
        # ---- Path B: (B, H, W) blocks, strided H reduction + lane matmul ----
        h_pad, w_pad = _round_up(H, 8), _round_up(W, 128)
        ho_pad = _round_up(Ho, 8)
        out_pad = _round_up(Ho * Wo, 128)
        per_plane = (2 * h_pad * w_pad * isz              # double-buffered input tile
                     + (h_pad + 2 * ho_pad) * w_pad * 4   # f32 slices + y (+ reshape copy)
                     + ho_pad * _round_up(Wo, 128) * 4    # matmul result
                     + 3 * out_pad * isz)                 # output (db) + f32 temp
        B = _choose_block_planes(NC, per_plane, budget)
        grid = (pl.cdiv(NC, B),)

        x_flat = x.reshape(NC, H, W)           # contiguous -> free reshape

        out_flat = pl.pallas_call(
            _make_tiled_pool_kernel(B, H, W, Ho, Wo),
            out_shape=jax.ShapeDtypeStruct((NC, Ho * Wo), x.dtype),
            grid=grid,
            in_specs=[pl.BlockSpec((B, H, W), lambda i: (i, 0, 0))],
            out_specs=pl.BlockSpec((B, Ho * Wo), lambda i: (i, 0)),
            compiler_params=pltpu.CompilerParams(
                dimension_semantics=("parallel",),
                vmem_limit_bytes=vmem_limit,
            ),
        )(x_flat)

    # Contiguous unflatten of (Ho*Wo) -> (Ho, Wo): free reshape, no transpose.
    return out_flat.reshape(N, C, Ho, Wo)


if __name__ == "__main__":
    key = jax.random.PRNGKey(0)
    k1, k2, k3 = jax.random.split(key, 3)

    # Main test: shapes implied by the module (NCHW, 4x4 pooling).
    x = jax.random.normal(k1, (2, 4, 16, 16), dtype=jnp.float32)
    out = avg_pool2d_pallas(x)
    jax.block_until_ready(out)
    ref = x.reshape(2, 4, 4, POOL, 4, POOL).mean(axis=(3, 5))
    assert out.shape == (2, 4, 4, 4), out.shape
    assert jnp.allclose(out, ref, atol=1e-5, rtol=1e-5)

    # Non-multiple-of-4 spatial dims (PyTorch floor mode), cropped inside the kernel.
    x2 = jax.random.normal(k2, (2, 3, 18, 21), dtype=jnp.float32)
    out2 = avg_pool2d_pallas(x2)
    jax.block_until_ready(out2)
    ref2 = x2[:, :, :16, :20].reshape(2, 3, 4, POOL, 5, POOL).mean(axis=(3, 5))
    assert out2.shape == (2, 3, 4, 5), out2.shape
    assert jnp.allclose(out2, ref2, atol=1e-5, rtol=1e-5)

    # Larger plane exercises the tiled (strided H-reduction + matmul) fallback path.
    x3 = jax.random.normal(k3, (1, 2, 64, 64), dtype=jnp.float32)
    out3 = avg_pool2d_pallas(x3)
    jax.block_until_ready(out3)
    ref3 = x3.reshape(1, 2, 16, POOL, 16, POOL).mean(axis=(3, 5))
    assert out3.shape == (1, 2, 16, 16), out3.shape
    assert jnp.allclose(out3, ref3, atol=1e-5, rtol=1e-5)

    print("KERNEL_OK")
</pallas_src>

<mosaic_0001>
module attributes {stable_mosaic.version = 11 : i64} {
  func.func @_flat_pool_kernel(%arg0: i32, %arg1: memref<8x256xf32, #tpu.memory_space<vmem>>, %arg2: memref<256x16xf32, #tpu.memory_space<vmem>>, %arg3: memref<8x16xf32, #tpu.memory_space<vmem>>) attributes {dimension_semantics = [#tpu.dimension_semantics<parallel>], iteration_bounds = array<i64: 1>, scalar_prefetch = 0 : i64, scratch_operands = 0 : i64, tpu.core_type = #tpu.core_type<tc>, window_params = [{transform_indices = @transform_0, window_bounds = array<i64: 8, 256>}, {pipeline_mode = #tpu.pipeline_mode<synchronous>, transform_indices = @transform_1, window_bounds = array<i64: 256, 16>}, {transform_indices = @transform_2, window_bounds = array<i64: 8, 16>}]} {
    %c0 = arith.constant 0 : index
    %c0_0 = arith.constant 0 : index
    %0 = vector.load %arg1[%c0, %c0_0] : memref<8x256xf32, #tpu.memory_space<vmem>>, vector<8x256xf32>
    %c0_1 = arith.constant 0 : index
    %c0_2 = arith.constant 0 : index
    %1 = vector.load %arg2[%c0_1, %c0_2] : memref<256x16xf32, #tpu.memory_space<vmem>>, vector<256x16xf32>
    %cst = arith.constant dense<0.000000e+00> : vector<8x16xf32>
    %2 = tpu.matmul %0, %1, %cst {dimension_numbers = #tpu.dot_dimension_numbers<[1], [0], [0], [1], [0, 0, 1, 1], [], []>} : vector<8x256xf32>, vector<256x16xf32>, vector<8x16xf32> -> vector<8x16xf32>
    %c0_3 = arith.constant 0 : index
    %c0_4 = arith.constant 0 : index
    %3 = vector.load %arg3[%c0_3, %c0_4] : memref<8x16xf32, #tpu.memory_space<vmem>>, vector<8x16xf32>
    tpu.vector_store %arg3[%c0_3, %c0_4], %2 {strides = array<i32>} : memref<8x16xf32, #tpu.memory_space<vmem>>, vector<8x16xf32>,
    return
  }
  func.func @transform_0(%arg0: i32) -> (i32, i32) {
    %c0_i32 = arith.constant 0 : i32
    %c0_i32_0 = arith.constant 0 : i32
    return %arg0, %c0_i32 : i32, i32
  }
  func.func @transform_1(%arg0: i32) -> (i32, i32) {
    %c0_i32 = arith.constant 0 : i32
    %c0_i32_0 = arith.constant 0 : i32
    %c0_i32_1 = arith.constant 0 : i32
    return %c0_i32, %c0_i32_0 : i32, i32
  }
  func.func @transform_2(%arg0: i32) -> (i32, i32) {
    %c0_i32 = arith.constant 0 : i32
    %c0_i32_0 = arith.constant 0 : i32
    return %arg0, %c0_i32 : i32, i32
  }
}

</mosaic_0001>

<bundles_post_ra>
// kernel: tpu_custom_call.1
= control target key start
LH: loop header
LB: loop body
LE: loop exit
PB: predicated region body
PF: predicated region fallthrough
CT: control target
= control target key end

     0   :  { %s354_s0 = inlined_call_operand.vmem [shape: f32[8,256], index: 0, kind: input, shape index: {}]   ;;  %s355_s1 = inlined_call_operand.vmem [shape: f32[256,16], index: 1, kind: input, shape index: {}]   ;;  %s356_s2 = inlined_call_operand.hbm [shape: f32[8,16], index: 2, kind: output, shape index: {}]  }
   0x1   :  { %v30_v0 = vld [vmem:[%s355_s1 + $0x80] sm:$0xff]  ;;  %v31_v1 = vld [vmem:[%s355_s1 + $0x88] sm:$0xff]  ;;  %v32_v5 = vld [vmem:[%s355_s1 + $0x90] sm:$0xff] }
   0x2   :  { %v14_v2 = vld [vmem:[%s355_s1] sm:$0xff]  ;;  %v167_v3 = vpack.c.bf16 %v31_v1, %v30_v0  ;;  %v15_v4 = vld [vmem:[%s355_s1 + $0x8] sm:$0xff]  ;;  %v33_v6 = vld [vmem:[%s355_s1 + $0x98] sm:$0xff] }
   0x3   :  { %v169_v7 = vpack.c.bf16 %v15_v4, %v14_v2  ;;  %v171_v8 = vpack.c.bf16 %v33_v6, %v32_v5  ;;  %v16_v9 = vld [vmem:[%s355_s1 + $0x10] sm:$0xff]  ;;  %v17_v10 = vld [vmem:[%s355_s1 + $0x18] sm:$0xff]  ;;  %v34_v11 = vld [vmem:[%s355_s1 + $0xa0] sm:$0xff] }
   0x4   :  { %168 = vmatprep.subr.bf16.mxu0 %v167_v3  ;;  %v35_v12 = vld [vmem:[%s355_s1 + $0xa8] sm:$0xff]  ;;  %v173_v13 = vpack.c.bf16 %v17_v10, %v16_v9  ;;  %v18_v15 = vld [vmem:[%s355_s1 + $0x20] sm:$0xff]  ;;  %v36_v17 = vld [vmem:[%s355_s1 + $0xb0] sm:$0xff] }
   0x5   :  { %170 = vmatpush3.bf16.msra.mxu0 %v169_v7  ;;  %v175_v14 = vpack.c.bf16 %v35_v12, %v34_v11  ;;  %v19_v16 = vld [vmem:[%s355_s1 + $0x28] sm:$0xff]  ;;  %v37_v18 = vld [vmem:[%s355_s1 + $0xb8] sm:$0xff]  ;;  %v20_v21 = vld [vmem:[%s355_s1 + $0x30] sm:$0xff] }
   0x6   :  { %172 = vmatprep.subr.bf16.mxu0 %v171_v8  ;;  %v177_v19 = vpack.c.bf16 %v19_v16, %v18_v15  ;;  %v179_v20 = vpack.c.bf16 %v37_v18, %v36_v17  ;;  %v21_v22 = vld [vmem:[%s355_s1 + $0x38] sm:$0xff]  ;;  %v38_v23 = vld [vmem:[%s355_s1 + $0xc0] sm:$0xff]  ;;  %v39_v24 = vld [vmem:[%s355_s1 + $0xc8] sm:$0xff] }
   0x7   :  { %v13_v25 = vld [vmem:[%s354_s0 + $0x8] sm:$0xff] }
   0x8   :  { %110 = vmatprep.mubr.f32.mxu0 %v13_v25 }
   0x9   :  { %174 = vmatpush3.bf16.msra.mxu0 %v173_v13 }
   0xa   :  { %176 = vmatprep.subr.bf16.mxu0 %v175_v14 }
   0xb   :  { %7 = vsyncpa [#allocation3], 0  ;;  %v181_v26 = vpack.c.bf16 %v21_v22, %v20_v21  ;;  %v183_v27 = vpack.c.bf16 %v39_v24, %v38_v23  ;;  %v22_v28 = vld [vmem:[%s355_s1 + $0x40] sm:$0xff]  ;;  %v23_v29 = vld [vmem:[%s355_s1 + $0x48] sm:$0xff]  ;;  %s224_s21 = smov [#allocation2]   ;;  %vm116_vm0 = vcmask 130048  }
   0xc   :  { %v40_v30 = vld [vmem:[%s355_s1 + $0xd0] sm:$0xff]  ;;  %v41_v31 = vld [vmem:[%s355_s1 + $0xd8] sm:$0xff]  ;;  %v185_v32 = vpack.c.bf16 %v23_v29, %v22_v28  ;;  %v42_v36 = vld [vmem:[%s355_s1 + $0xe0] sm:$0xff]  ;;  %s124_s22 = sshll.u32 %s224_s21, 4  ;;  %s125_s22 = int_to_ptr.vmem [resolvable:$true] %s124_s22 }
   0xd   :  { %178 = vmatpush3.bf16.msra.mxu0 %v177_v19  ;;  %v187_v33 = vpack.c.bf16 %v41_v31, %v40_v30  ;;  %v24_v34 = vld [vmem:[%s355_s1 + $0x50] sm:$0xff]  ;;  %v25_v35 = vld [vmem:[%s355_s1 + $0x58] sm:$0xff]  ;;  %v43_v37 = vld [vmem:[%s355_s1 + $0xe8] sm:$0xff]  ;;  %s200_s23 = scalar_lea.vmem %s125_s22, 128  ;;  %p205_p1 = scmp.lt.s32.totalorder %s125_s22, %s125_s22 }
   0xe   :  { %180 = vmatprep.subr.bf16.mxu0 %v179_v20  ;;  %v189_v38 = vpack.c.bf16 %v25_v35, %v24_v34  ;;  %v191_v39 = vpack.c.bf16 %v43_v37, %v42_v36  ;;  %v26_v40 = vld [vmem:[%s355_s1 + $0x60] sm:$0xff]  ;;  %v27_v41 = vld [vmem:[%s355_s1 + $0x68] sm:$0xff]  ;;  %v44_v42 = vld [vmem:[%s355_s1 + $0xf0] sm:$0xff]  ;;  %p201_p0 = scmp.ne.s32.totalorder %s125_s22, %s200_s23  ;;  %p206_p2 = scmp.lt.s32.totalorder %s200_s23, %s200_s23 }
   0xf   :  { %v45_v43 = vld [vmem:[%s355_s1 + $0xf8] sm:$0xff]  ;;  %v193_v44 = vpack.c.bf16 %v27_v41, %v26_v40  ;;  %v28_v46 = vld [vmem:[%s355_s1 + $0x70] sm:$0xff]  ;;  %v12_v49 = vld [vmem:[%s354_s0] sm:$0xff] }
  0x10   :  { %v195_v45 = vpack.c.bf16 %v45_v43, %v44_v42  ;;  %v29_v47 = vld [vmem:[%s355_s1 + $0x78] sm:$0xff]  ;;  %p207_p3 = por %p206_p2, %p205_p1 }
  0x11   :  { %182 = vmatpush3.bf16.msra.mxu0 %v181_v26  ;;  %v197_v48 = vpack.c.bf16 %v29_v47, %v28_v46 }
  0x12   :  { %184 = vmatprep.subr.bf16.mxu0 %v183_v27  ;;  %p208_p4 = pnand %p207_p3, %p201_p0 }
  0x15   :  { %186 = vmatpush3.bf16.msra.mxu0 %v185_v32 }
  0x16   :  { %188 = vmatprep.subr.bf16.mxu0 %v187_v33 }
  0x19   :  { %190 = vmatpush3.bf16.msra.mxu0 %v189_v38 }
  0x1a   :  { %192 = vmatprep.subr.bf16.mxu0 %v191_v39 }
  0x1d   :  { %194 = vmatpush3.bf16.msra.mxu0 %v193_v44 }
  0x1e   :  { %196 = vmatprep.subr.bf16.mxu0 %v195_v45 }
  0x21   :  { %198 = vmatpush3.bf16.msra.mxu0 %v197_v48 }
  0x24   :  { %111 = vmatmul.mubr.f32.vlgmr.msra.gmra.mrb[0].mxu0 %v12_v49 }
  0xf7   :  { %v164_v50 = vpop.f32.mrb[0].mxu0 }
  0xf8   :  { %v165_v51 = vpop.f32.mrb[1].mxu0 }
  0xf9   :  { %v166_v52 = vadd.f32 %v165_v51, %v164_v50 }
  0xfb   :  { %117 = vst.msk [vmem:[#allocation2] sm:$0xff] %vm116_vm0, %v166_v52 }
  0xfc   :  { %211 = shalt.err (!%p208_p4)
}
  0xfd   :  { %s212_s0 = scalar_lea.hbm %s356_s2, 128 }
  0xfe   :  { %p213_p5 = scmp.ne.s32.totalorder %s356_s2, %s212_s0  ;;  %p216_p6 = scmp.lt.u32.totalorder %s212_s0, %s356_s2 }
 0x100   :  { %p218_p7 = pnand %p216_p6, %p213_p5 }
 0x102   :  { %221 = shalt.err (!%p218_p7)
}
 0x103   :  { %127 = dma.vmem_to_hbm [thread:$0]  %s125_s22, 128, %s356_s2, [#allocation3]  }
 0x104   :  { %222 = dma.done.wait [#allocation3], 128  }
 0x105   :  { %223 = vsyncadd [#allocation3], 4294967168 }
 0x106   :  { %131 = vsyncpa [#allocation3], 1 }

</bundles_post_ra>
